<compile_context>
chip_gen: v7x
topology: tpu7x:2x2x1
jax: 0.10.0
libtpu: 0.0.40
codegen_flags: <defaults>
</compile_context>

<pallas_src>
import numpy as np
import jax
import jax.numpy as jnp
from jax.experimental import pallas as pl
from jax.experimental.pallas import tpu as pltpu


# ---------------------------------------------------------------------------
# Kernels
# ---------------------------------------------------------------------------

def _img_grad_tiled_kernel(x_ref, top_ref, bot_ref, o_ref):
    # x_ref:   (1, C, tH, W)  main tile
    # top_ref: (1, C, 8,  W)  8-row block containing the "up" halo row
    # bot_ref: (1, C, 8,  W)  8-row block containing the "down" halo row
    # o_ref:   (1, 1, tH, W)
    i = pl.program_id(1)
    n_i = pl.num_programs(1)
    C = x_ref.shape[1]

    # Streamed channel reduction in f32 (no full (C, tH, W) f32 materialization).
    s = x_ref[0, 0].astype(jnp.float32)            # (tH, W)
    st = top_ref[0, 0].astype(jnp.float32)         # (8, W)
    sb = bot_ref[0, 0].astype(jnp.float32)         # (8, W)
    for c in range(1, C):
        s = s + x_ref[0, c].astype(jnp.float32)
        st = st + top_ref[0, c].astype(jnp.float32)
        sb = sb + bot_ref[0, c].astype(jnp.float32)

    tH, W = s.shape

    # Pick the actual halo rows out of the 8-row halo blocks:
    #   top:    row 7 of the previous 8-row block; tile 0 -> row 0 of block 0
    #           (the edge row itself == ReplicationPad2d).
    #   bottom: row 0 of the next 8-row block; last tile -> row 7 of the final
    #           block (row H-1, the edge row itself).
    up_halo = jnp.where(i == 0, st[0:1, :], st[7:8, :])          # (1, W)
    down_halo = jnp.where(i == n_i - 1, sb[7:8, :], sb[0:1, :])  # (1, W)

    lrow = jax.lax.broadcasted_iota(jnp.int32, (tH, W), 0)
    col = jax.lax.broadcasted_iota(jnp.int32, (tH, W), 1)

    # Neighbour reads as XLU rolls; wrapped row/col replaced by halo / edge value.
    up = jnp.where(lrow == 0, up_halo, pltpu.roll(s, shift=1, axis=0))
    down = jnp.where(lrow == tH - 1, down_halo, pltpu.roll(s, shift=tH - 1, axis=0))
    left = jnp.where(col == 0, s, pltpu.roll(s, shift=1, axis=1))
    right = jnp.where(col == W - 1, s, pltpu.roll(s, shift=W - 1, axis=1))

    o_ref[0, 0] = (0.5 * (up - left + right - down)).astype(o_ref.dtype)


def _img_grad_whole_kernel(x_ref, o_ref):
    # Fallback (H not a multiple of 8): whole image height per grid step.
    # x_ref: (1, C, H, W); o_ref: (1, 1, H, W)
    C = x_ref.shape[1]
    s = x_ref[0, 0].astype(jnp.float32)
    for c in range(1, C):
        s = s + x_ref[0, c].astype(jnp.float32)
    H, W = s.shape

    row = jax.lax.broadcasted_iota(jnp.int32, (H, W), 0)
    col = jax.lax.broadcasted_iota(jnp.int32, (H, W), 1)

    up = jnp.where(row == 0, s, pltpu.roll(s, shift=1, axis=0))
    down = jnp.where(row == H - 1, s, pltpu.roll(s, shift=H - 1, axis=0))
    left = jnp.where(col == 0, s, pltpu.roll(s, shift=1, axis=1))
    right = jnp.where(col == W - 1, s, pltpu.roll(s, shift=W - 1, axis=1))

    o_ref[0, 0] = (0.5 * (up - left + right - down)).astype(o_ref.dtype)


# ---------------------------------------------------------------------------
# Wrapper
# ---------------------------------------------------------------------------

def _pick_tile_h(H, W, C, itemsize, target_bytes):
    """Smallest multiple-of-8 divisor of H whose per-step main-block DMA is at
    least `target_bytes` (maximizes pipeline depth while keeping steps large).
    Falls back to the whole height when H is not a multiple of 8 or when even
    the whole image is below target."""
    if H % 8 != 0:
        return H
    for d in range(8, H + 1, 8):
        if H % d == 0 and d * W * C * itemsize >= target_bytes:
            return d
    return H


def _vmem_limit_bytes(need_bytes):
    """Generation-aware VMEM request: ~75% of physical capacity, >= 32 MiB,
    and at least what this kernel's buffers need (clamped to the cap)."""
    try:
        phys = int(pltpu.get_tpu_info().vmem_capacity_bytes)
    except Exception:
        phys = 64 * 1024 * 1024  # conservative (v7x per-TC physical VMEM)
    cap = (phys * 3) // 4
    return int(min(cap, max(32 * 1024 * 1024, need_bytes)))


def img_grad_grad_loss(image, *, h_block_bytes_target=4 << 20):
    """ImgGrad(cin, pattern='grad_loss').forward — image: [B,C,H,W] -> [B,1,H,W]."""
    B, C, H, W = image.shape
    itemsize = image.dtype.itemsize

    cost = pl.CostEstimate(
        flops=int(B * H * W * (C + 8)),
        transcendentals=0,
        bytes_accessed=int(B * C * H * W * itemsize + B * H * W * itemsize),
    )

    tH = _pick_tile_h(H, W, C, itemsize, h_block_bytes_target)

    if H % 8 == 0:
        # ----- tiled path: grid over (batch, H tiles), halo rows via extra specs
        n_h = H // tH
        bh = tH // 8          # 8-row blocks per H tile
        h8 = H // 8           # total 8-row blocks in the image

        main_bytes = C * tH * W * itemsize
        halo_bytes = C * 8 * W * itemsize
        out_bytes = tH * W * itemsize
        need = (2 * (main_bytes + 2 * halo_bytes)   # double-buffered inputs
                + 2 * out_bytes                     # double-buffered output
                + 8 * tH * W * 4                    # f32 intermediates
                + (4 << 20))                        # compiler scratch headroom

        main_spec = pl.BlockSpec((1, C, tH, W), lambda b, i: (b, 0, i, 0))
        top_spec = pl.BlockSpec(
            (1, C, 8, W), lambda b, i: (b, 0, jnp.maximum(i * bh - 1, 0), 0))
        bot_spec = pl.BlockSpec(
            (1, C, 8, W), lambda b, i: (b, 0, jnp.minimum((i + 1) * bh, h8 - 1), 0))

        return pl.pallas_call(
            _img_grad_tiled_kernel,
            out_shape=jax.ShapeDtypeStruct((B, 1, H, W), image.dtype),
            grid_spec=pltpu.PrefetchScalarGridSpec(
                num_scalar_prefetch=0,
                grid=(B, n_h),
                in_specs=[main_spec, top_spec, bot_spec],
                out_specs=pl.BlockSpec((1, 1, tH, W), lambda b, i: (b, 0, i, 0)),
            ),
            compiler_params=pltpu.CompilerParams(
                dimension_semantics=("parallel", "parallel"),
                vmem_limit_bytes=_vmem_limit_bytes(need),
            ),
            cost_estimate=cost,
        )(image, image, image)

    # ----- fallback path (H not a multiple of 8): whole height per batch step
    need = 2 * (C * H * W * itemsize) + 2 * (H * W * itemsize) + 8 * H * W * 4 + (4 << 20)
    return pl.pallas_call(
        _img_grad_whole_kernel,
        out_shape=jax.ShapeDtypeStruct((B, 1, H, W), image.dtype),
        grid_spec=pltpu.PrefetchScalarGridSpec(
            num_scalar_prefetch=0,
            grid=(B,),
            in_specs=[pl.BlockSpec((1, C, H, W), lambda b: (b, 0, 0, 0))],
            out_specs=pl.BlockSpec((1, 1, H, W), lambda b: (b, 0, 0, 0)),
        ),
        compiler_params=pltpu.CompilerParams(
            dimension_semantics=("parallel",),
            vmem_limit_bytes=_vmem_limit_bytes(need),
        ),
        cost_estimate=cost,
    )(image)


# ---------------------------------------------------------------------------
# Pure-JAX reference (PyTorch forward verbatim)
# ---------------------------------------------------------------------------

def img_grad_reference(image):
    """ReplicationPad2d(1) + fixed 3x3 Conv2d(cin->1, bias=False)."""
    B, C, H, W = image.shape
    padded = jnp.pad(image, ((0, 0), (0, 0), (1, 1), (1, 1)), mode="edge")
    w = jnp.array([[0.0, 0.5, 0.0],
                   [-0.5, 0.0, 0.5],
                   [0.0, -0.5, 0.0]], dtype=image.dtype)
    kernel = jnp.tile(w[None, None, :, :], (1, C, 1, 1))   # (1, C, 3, 3) OIHW
    return jax.lax.conv_general_dilated(
        padded, kernel, window_strides=(1, 1), padding="VALID",
        dimension_numbers=("NCHW", "OIHW", "NCHW"))


if __name__ == "__main__":
    key = jax.random.PRNGKey(0)

    # 1) Small shape (single H tile; W=128 -> fully lane-dense stores).
    k1, k2, k3 = jax.random.split(key, 3)
    img1 = jax.random.normal(k1, (2, 4, 32, 128), dtype=jnp.float32)
    out1 = jax.block_until_ready(img_grad_grad_loss(img1))
    np.testing.assert_allclose(np.asarray(out1), np.asarray(img_grad_reference(img1)),
                               rtol=1e-5, atol=1e-5)

    # 2) Force the multi-tile halo path (small per-step target -> tH=32, 8 H tiles).
    img2 = jax.random.normal(k2, (2, 4, 256, 256), dtype=jnp.float32)
    out2 = jax.block_until_ready(
        img_grad_grad_loss(img2, h_block_bytes_target=128 * 1024))
    np.testing.assert_allclose(np.asarray(out2), np.asarray(img_grad_reference(img2)),
                               rtol=1e-5, atol=1e-5)

    # 3) Fallback path: H not a multiple of 8.
    img3 = jax.random.normal(k3, (2, 4, 20, 128), dtype=jnp.float32)
    out3 = jax.block_until_ready(img_grad_grad_loss(img3))
    np.testing.assert_allclose(np.asarray(out3), np.asarray(img_grad_reference(img3)),
                               rtol=1e-5, atol=1e-5)

    print("KERNEL_OK")
</pallas_src>

<mosaic_0001>
module attributes {stable_mosaic.version = 11 : i64} {
  func.func @_img_grad_tiled_kernel(%arg0: i32, %arg1: i32, %arg2: memref<1x4x32x128xf32, #tpu.memory_space<vmem>>, %arg3: memref<1x4x8x128xf32, #tpu.memory_space<vmem>>, %arg4: memref<1x4x8x128xf32, #tpu.memory_space<vmem>>, %arg5: memref<1x1x32x128xf32, #tpu.memory_space<vmem>>) attributes {dimension_semantics = [#tpu.dimension_semantics<parallel>, #tpu.dimension_semantics<parallel>], iteration_bounds = array<i64: 2, 1>, scalar_prefetch = 0 : i64, scratch_operands = 0 : i64, tpu.core_type = #tpu.core_type<tc>, window_params = [{transform_indices = @transform_0, window_bounds = array<i64: 1, 4, 32, 128>}, {transform_indices = @transform_1, window_bounds = array<i64: 1, 4, 8, 128>}, {transform_indices = @transform_2, window_bounds = array<i64: 1, 4, 8, 128>}, {transform_indices = @transform_3, window_bounds = array<i64: 1, 1, 32, 128>}]} {
    %c0 = arith.constant 0 : index
    %c0_0 = arith.constant 0 : index
    %c0_1 = arith.constant 0 : index
    %c0_2 = arith.constant 0 : index
    %0 = vector.load %arg2[%c0, %c0_0, %c0_1, %c0_2] : memref<1x4x32x128xf32, #tpu.memory_space<vmem>>, vector<1x1x32x128xf32>
    %1 = vector.shape_cast %0 : vector<1x1x32x128xf32> to vector<32x128xf32>
    %c0_3 = arith.constant 0 : index
    %c0_4 = arith.constant 0 : index
    %c0_5 = arith.constant 0 : index
    %c0_6 = arith.constant 0 : index
    %2 = vector.load %arg3[%c0_3, %c0_4, %c0_5, %c0_6] : memref<1x4x8x128xf32, #tpu.memory_space<vmem>>, vector<1x1x8x128xf32>
    %3 = vector.shape_cast %2 : vector<1x1x8x128xf32> to vector<8x128xf32>
    %c0_7 = arith.constant 0 : index
    %c0_8 = arith.constant 0 : index
    %c0_9 = arith.constant 0 : index
    %c0_10 = arith.constant 0 : index
    %4 = vector.load %arg4[%c0_7, %c0_8, %c0_9, %c0_10] : memref<1x4x8x128xf32, #tpu.memory_space<vmem>>, vector<1x1x8x128xf32>
    %5 = vector.shape_cast %4 : vector<1x1x8x128xf32> to vector<8x128xf32>
    %c0_11 = arith.constant 0 : index
    %c1 = arith.constant 1 : index
    %c0_12 = arith.constant 0 : index
    %c0_13 = arith.constant 0 : index
    %6 = vector.load %arg2[%c0_11, %c1, %c0_12, %c0_13] : memref<1x4x32x128xf32, #tpu.memory_space<vmem>>, vector<1x1x32x128xf32>
    %7 = vector.shape_cast %6 : vector<1x1x32x128xf32> to vector<32x128xf32>
    %8 = arith.addf %1, %7 : vector<32x128xf32>
    %c0_14 = arith.constant 0 : index
    %c1_15 = arith.constant 1 : index
    %c0_16 = arith.constant 0 : index
    %c0_17 = arith.constant 0 : index
    %9 = vector.load %arg3[%c0_14, %c1_15, %c0_16, %c0_17] : memref<1x4x8x128xf32, #tpu.memory_space<vmem>>, vector<1x1x8x128xf32>
    %10 = vector.shape_cast %9 : vector<1x1x8x128xf32> to vector<8x128xf32>
    %11 = arith.addf %3, %10 : vector<8x128xf32>
    %c0_18 = arith.constant 0 : index
    %c1_19 = arith.constant 1 : index
    %c0_20 = arith.constant 0 : index
    %c0_21 = arith.constant 0 : index
    %12 = vector.load %arg4[%c0_18, %c1_19, %c0_20, %c0_21] : memref<1x4x8x128xf32, #tpu.memory_space<vmem>>, vector<1x1x8x128xf32>
    %13 = vector.shape_cast %12 : vector<1x1x8x128xf32> to vector<8x128xf32>
    %14 = arith.addf %5, %13 : vector<8x128xf32>
    %c0_22 = arith.constant 0 : index
    %c2 = arith.constant 2 : index
    %c0_23 = arith.constant 0 : index
    %c0_24 = arith.constant 0 : index
    %15 = vector.load %arg2[%c0_22, %c2, %c0_23, %c0_24] : memref<1x4x32x128xf32, #tpu.memory_space<vmem>>, vector<1x1x32x128xf32>
    %16 = vector.shape_cast %15 : vector<1x1x32x128xf32> to vector<32x128xf32>
    %17 = arith.addf %8, %16 : vector<32x128xf32>
    %c0_25 = arith.constant 0 : index
    %c2_26 = arith.constant 2 : index
    %c0_27 = arith.constant 0 : index
    %c0_28 = arith.constant 0 : index
    %18 = vector.load %arg3[%c0_25, %c2_26, %c0_27, %c0_28] : memref<1x4x8x128xf32, #tpu.memory_space<vmem>>, vector<1x1x8x128xf32>
    %19 = vector.shape_cast %18 : vector<1x1x8x128xf32> to vector<8x128xf32>
    %20 = arith.addf %11, %19 : vector<8x128xf32>
    %c0_29 = arith.constant 0 : index
    %c2_30 = arith.constant 2 : index
    %c0_31 = arith.constant 0 : index
    %c0_32 = arith.constant 0 : index
    %21 = vector.load %arg4[%c0_29, %c2_30, %c0_31, %c0_32] : memref<1x4x8x128xf32, #tpu.memory_space<vmem>>, vector<1x1x8x128xf32>
    %22 = vector.shape_cast %21 : vector<1x1x8x128xf32> to vector<8x128xf32>
    %23 = arith.addf %14, %22 : vector<8x128xf32>
    %c0_33 = arith.constant 0 : index
    %c3 = arith.constant 3 : index
    %c0_34 = arith.constant 0 : index
    %c0_35 = arith.constant 0 : index
    %24 = vector.load %arg2[%c0_33, %c3, %c0_34, %c0_35] : memref<1x4x32x128xf32, #tpu.memory_space<vmem>>, vector<1x1x32x128xf32>
    %25 = vector.shape_cast %24 : vector<1x1x32x128xf32> to vector<32x128xf32>
    %26 = arith.addf %17, %25 : vector<32x128xf32>
    %c0_36 = arith.constant 0 : index
    %c3_37 = arith.constant 3 : index
    %c0_38 = arith.constant 0 : index
    %c0_39 = arith.constant 0 : index
    %27 = vector.load %arg3[%c0_36, %c3_37, %c0_38, %c0_39] : memref<1x4x8x128xf32, #tpu.memory_space<vmem>>, vector<1x1x8x128xf32>
    %28 = vector.shape_cast %27 : vector<1x1x8x128xf32> to vector<8x128xf32>
    %29 = arith.addf %20, %28 : vector<8x128xf32>
    %c0_40 = arith.constant 0 : index
    %c3_41 = arith.constant 3 : index
    %c0_42 = arith.constant 0 : index
    %c0_43 = arith.constant 0 : index
    %30 = vector.load %arg4[%c0_40, %c3_41, %c0_42, %c0_43] : memref<1x4x8x128xf32, #tpu.memory_space<vmem>>, vector<1x1x8x128xf32>
    %31 = vector.shape_cast %30 : vector<1x1x8x128xf32> to vector<8x128xf32>
    %32 = arith.addf %23, %31 : vector<8x128xf32>
    %c0_i32 = arith.constant 0 : i32
    %33 = arith.cmpi eq, %arg1, %c0_i32 : i32
    %34 = vector.extract_strided_slice %29 {offsets = [0, 0], sizes = [1, 128], strides = [1, 1]} : vector<8x128xf32> to vector<1x128xf32>
    %35 = vector.extract_strided_slice %29 {offsets = [7, 0], sizes = [1, 128], strides = [1, 1]} : vector<8x128xf32> to vector<1x128xf32>
    %36 = arith.select %33, %34, %35 : vector<1x128xf32>
    %c0_i32_44 = arith.constant 0 : i32
    %37 = arith.cmpi eq, %arg1, %c0_i32_44 : i32
    %38 = vector.extract_strided_slice %32 {offsets = [7, 0], sizes = [1, 128], strides = [1, 1]} : vector<8x128xf32> to vector<1x128xf32>
    %39 = vector.extract_strided_slice %32 {offsets = [0, 0], sizes = [1, 128], strides = [1, 1]} : vector<8x128xf32> to vector<1x128xf32>
    %40 = arith.select %37, %38, %39 : vector<1x128xf32>
    %41 = tpu.iota {dimensions = array<i32: 0>} : vector<32x128xi32>
    %42 = tpu.iota {dimensions = array<i32: 1>} : vector<32x128xi32>
    %c0_i32_45 = arith.constant 0 : i32
    %43 = vector.broadcast %c0_i32_45 : i32 to vector<32x128xi32>
    %44 = arith.cmpi eq, %41, %43 : vector<32x128xi32>
    %c1_i32 = arith.constant 1 : i32
    %45 = tpu.dynamic_rotate %26 by %c1_i32 dim 0 : vector<32x128xf32>, i32 -> vector<32x128xf32>
    %46 = vector.shape_cast %36 : vector<1x128xf32> to vector<1x128xf32>
    %47 = vector.broadcast %46 : vector<1x128xf32> to vector<32x128xf32>
    %48 = arith.select %44, %47, %45 : vector<32x128xi1>, vector<32x128xf32>
    %c31_i32 = arith.constant 31 : i32
    %49 = vector.broadcast %c31_i32 : i32 to vector<32x128xi32>
    %50 = arith.cmpi eq, %41, %49 : vector<32x128xi32>
    %c31_i32_46 = arith.constant 31 : i32
    %51 = tpu.dynamic_rotate %26 by %c31_i32_46 dim 0 : vector<32x128xf32>, i32 -> vector<32x128xf32>
    %52 = vector.shape_cast %40 : vector<1x128xf32> to vector<1x128xf32>
    %53 = vector.broadcast %52 : vector<1x128xf32> to vector<32x128xf32>
    %54 = arith.select %50, %53, %51 : vector<32x128xi1>, vector<32x128xf32>
    %c0_i32_47 = arith.constant 0 : i32
    %55 = vector.broadcast %c0_i32_47 : i32 to vector<32x128xi32>
    %56 = arith.cmpi eq, %42, %55 : vector<32x128xi32>
    %c1_i32_48 = arith.constant 1 : i32
    %57 = tpu.dynamic_rotate %26 by %c1_i32_48 dim 1 : vector<32x128xf32>, i32 -> vector<32x128xf32>
    %58 = arith.select %56, %26, %57 : vector<32x128xi1>, vector<32x128xf32>
    %c127_i32 = arith.constant 127 : i32
    %59 = vector.broadcast %c127_i32 : i32 to vector<32x128xi32>
    %60 = arith.cmpi eq, %42, %59 : vector<32x128xi32>
    %c127_i32_49 = arith.constant 127 : i32
    %61 = tpu.dynamic_rotate %26 by %c127_i32_49 dim 1 : vector<32x128xf32>, i32 -> vector<32x128xf32>
    %62 = arith.select %60, %26, %61 : vector<32x128xi1>, vector<32x128xf32>
    %63 = arith.subf %48, %58 : vector<32x128xf32>
    %64 = arith.addf %63, %62 : vector<32x128xf32>
    %65 = arith.subf %64, %54 : vector<32x128xf32>
    %cst = arith.constant 5.000000e-01 : f32
    %66 = vector.broadcast %cst : f32 to vector<32x128xf32>
    %67 = arith.mulf %66, %65 : vector<32x128xf32>
    %c0_50 = arith.constant 0 : index
    %c0_51 = arith.constant 0 : index
    %c0_52 = arith.constant 0 : index
    %c0_53 = arith.constant 0 : index
    %68 = vector.load %arg5[%c0_50, %c0_51, %c0_52, %c0_53] : memref<1x1x32x128xf32, #tpu.memory_space<vmem>>, vector<1x1x32x128xf32>
    %69 = vector.shape_cast %68 : vector<1x1x32x128xf32> to vector<32x128xf32>
    %70 = vector.shape_cast %67 : vector<32x128xf32> to vector<1x1x32x128xf32>
    tpu.vector_store %arg5[%c0_50, %c0_51, %c0_52, %c0_53], %70 {strides = array<i32>} : memref<1x1x32x128xf32, #tpu.memory_space<vmem>>, vector<1x1x32x128xf32>,
    return
  }
  func.func @transform_0(%arg0: i32, %arg1: i32) -> (i32, i32, i32, i32) {
    %c0_i32 = arith.constant 0 : i32
    %c0_i32_0 = arith.constant 0 : i32
    %c0_i32_1 = arith.constant 0 : i32
    return %arg0, %c0_i32, %arg1, %c0_i32_0 : i32, i32, i32, i32
  }
  func.func @transform_1(%arg0: i32, %arg1: i32) -> (i32, i32, i32, i32) {
    %c4_i32 = arith.constant 4 : i32
    %0 = arith.muli %arg1, %c4_i32 : i32
    %c1_i32 = arith.constant 1 : i32
    %1 = arith.subi %0, %c1_i32 : i32
    %c0_i32 = arith.constant 0 : i32
    %2 = arith.maxsi %1, %c0_i32 : i32
    %c0_i32_0 = arith.constant 0 : i32
    %c0_i32_1 = arith.constant 0 : i32
    %c0_i32_2 = arith.constant 0 : i32
    return %arg0, %c0_i32_0, %2, %c0_i32_1 : i32, i32, i32, i32
  }
  func.func @transform_2(%arg0: i32, %arg1: i32) -> (i32, i32, i32, i32) {
    %c1_i32 = arith.constant 1 : i32
    %0 = arith.addi %arg1, %c1_i32 : i32
    %c4_i32 = arith.constant 4 : i32
    %1 = arith.muli %0, %c4_i32 : i32
    %c3_i32 = arith.constant 3 : i32
    %2 = arith.minsi %1, %c3_i32 : i32
    %c0_i32 = arith.constant 0 : i32
    %c0_i32_0 = arith.constant 0 : i32
    %c0_i32_1 = arith.constant 0 : i32
    return %arg0, %c0_i32, %2, %c0_i32_0 : i32, i32, i32, i32
  }
  func.func @transform_3(%arg0: i32, %arg1: i32) -> (i32, i32, i32, i32) {
    %c0_i32 = arith.constant 0 : i32
    %c0_i32_0 = arith.constant 0 : i32
    %c0_i32_1 = arith.constant 0 : i32
    return %arg0, %c0_i32, %arg1, %c0_i32_0 : i32, i32, i32, i32
  }
}

</mosaic_0001>

<bundles_post_ra>
// kernel: tpu_custom_call.1
= control target key start
LH: loop header
LB: loop body
LE: loop exit
PB: predicated region body
PF: predicated region fallthrough
CT: control target
= control target key end

     0   :  { %s1349_s0 = inlined_call_operand.hbm [shape: f32[2,4,32,128], index: 0, kind: input, shape index: {}]   ;;  %s1350_s1 = inlined_call_operand.hbm [shape: f32[2,4,32,128], index: 1, kind: input, shape index: {}]   ;;  %s1351_s2 = inlined_call_operand.hbm [shape: f32[2,4,32,128], index: 2, kind: input, shape index: {}]   ;;  %s1352_s3 = inlined_call_operand.hbm [shape: f32[2,1,32,128], index: 3, kind: output, shape index: {}]  }
   0x1   :  { %1363 = sst [smem:[#allocation16_spill]] %s1350_s1 }
   0x2   :  { %8 = vsyncpa [#allocation3], 0 }
   0x3   :  { %10 = vsyncpa [#allocation3 + $0x1], 0 }
   0x4   :  { %11 = vsyncpa [#allocation6], 0 }
   0x5   :  { %13 = vsyncpa [#allocation6 + $0x1], 0 }
   0x6   :  { %14 = vsyncpa [#allocation4], 0 }
   0x7   :  { %16 = vsyncpa [#allocation4 + $0x1], 0  ;;  %s967_s12 = smov 0   ;;  %s969_s13 = smov 0  }
   0x8   :  { %s971_s14 = smov 0   ;;  %s973_s15 = smov 0  }
   0x9   :  { %s975_s16 = smov 0   ;;  %s977_s17 = smov 0  }
   0xa LB: > { %1364 = sst [smem:[#allocation12_spill]] %s922_s14  ;;  %s998_s18 = sadd.s32 4294967295, %s934_s17   ;;  %s934_s17 = sphi %s977_s17, %s22_s17   ;;  %s930_s16 = sphi %s975_s16, %s1387_s16   ;;  %s926_s15 = sphi %s973_s15, %s1386_s15   ;;  %s922_s14 = sphi %s971_s14, %s1385_s14   ;;  %s918_s13 = sphi %s969_s13, %s1389_s13   ;;  %s914_s12 = sphi %s967_s12, %s1388_s12  }
   0xb   : > { %1365 = sst [smem:[#allocation13_spill]] %s930_s16  ;;  %s633_s19 = sadd.s32 4294967294, %s934_s17  }
   0xc   : > { %s34_s20 = sadd.s32 1, %s930_s16  ;;  %s43_s21 = sadd.s32 1, %s922_s14 }
   0xd   : > { %p36_p0 = scmp.ge.s32.totalorder %s34_s20, 2  ;;  %p50_p1 = scmp.ne.s32.totalorder %s922_s14, %s918_s13 }
   0xe   : > { %p51_p2 = scmp.eq.s32.totalorder %s934_s17, 0  ;;  %p56_p3 = scmp.ne.s32.totalorder %s918_s13, %s914_s12 }
   0xf   : > { %s1391_s20 = smov (%p36_p0, %s34_s20), 0  ;;  %p57_p5 = scmp.eq.s32.totalorder %s998_s18, 0 }
  0x10   : > { %1366 = sst [smem:[#allocation14_spill]] %s1391_s20  ;;  %p1010_p4 = por %p51_p2, %p50_p1 }
  0x11   : > { %s38_s23 = ssub.s32 %s930_s16, %s1391_s20  ;;  %p154_p6 = scmp.eq.s32.totalorder %s998_s18, 1 }
  0x12   : > { %p41_p7 = scmp.eq.s32.totalorder %s38_s23, 0  ;;  %p1018_p8 = por %p57_p5, %p56_p3 }
  0x13   : > { %p1022_p9 = por %p154_p6, %p50_p1  ;;  %p160_p10 = scmp.eq.s32.totalorder %s633_s19, 1 }
  0x14   : > { %s1368_s24 = scalar_select %p1018_p8, 1, 0 }
  0x15   : > { %s1369_s25 = scalar_select %p1022_p9, 1, 0 }
  0x16   : > { %s1027_s26 = scalar_select %p41_p7, %s922_s14, %s43_s21  }
  0x17   : > { %p1029_p11 = por %p160_p10, %p56_p3  ;;  %p701_p13 = scmp.lt.s32.totalorder %s934_s17, 2 }
  0x18   : > { %1370 = sst [smem:[#allocation15_spill]] %s1027_s26  ;;  %s1036_s28 = sand.u32 1, %s922_s14  }
  0x19   : > { %s1371_s27 = scalar_select %p1029_p11, 1, 0 }
  0x1a   : > { %s1039_s29 = sshll.u32 %s930_s16, 11  ;;  %p1043_p0 = pnand %p701_p13, %p1010_p4 }
  0x1b   : > { %s203_s4 = sand.u32 1, %s934_s17   ;;  %s639_s5 = sshll.u32 %s1036_s28, 5 }
  0x1c   : > { %s1373_s1 = sld [smem:[#allocation16_spill]]  ;;  %s207_s9 = scalar_lea.vmem [#allocation5], %s639_s5 }
  0x1d   : > { %s219_s10 = sshll.u32 %s207_s9, 4  ;;  %s1059_s11 = scalar_lea.sflag [#allocation6], %s203_s4  ;;  %s1057_s10 = int_to_ptr.vmem [resolvable:$true] %s219_s10 }
  0x1e   : > { %p1065_p2 = pneg %p1043_p0 }
  0x22   : > { %s1053_s8 = scalar_lea.hbm %s1373_s1, %s1039_s29  ;;  %s763_s6 = scalar_lea.hbm %s1373_s1, 4096 }
  0x23   : > { %s758_s19 = scalar_lea.hbm %s1053_s8, 512  ;;  %p764_p5 = scmp.lt.u32.totalorder %s1053_s8, %s1373_s1 }
  0x24   : > { %p759_p1 = scmp.ne.s32.totalorder %s1053_s8, %s758_s19  ;;  %p765_p6 = scmp.lt.u32.totalorder %s763_s6, %s758_s19 }
  0x25   : > { %p767_p10 = scmp.lt.u32.totalorder %s758_s19, %s1053_s8 }
  0x26   : > { %p761_p3 = pnand %p1065_p2, %p759_p1  ;;  %p766_p7 = por %p765_p6, %p764_p5 }
  0x28   : > { %p762_p4 = pneg %p761_p3  ;;  %p768_p13 = por %p767_p10, %p766_p7 }
  0x2a   : > { %p769_p12 = pnand %p768_p13, %p762_p4 }
  0x2c   : > { %772 = shalt.err (!%p769_p12)
}
  0x2d   : > { %s773_s4 = scalar_lea.vmem %s1057_s10, 512  ;;  %s936_s22 = smov [#allocation5]  }
  0x2e   : > { %p774_p1 = scmp.ne.s32.totalorder %s1057_s10, %s773_s4  ;;  %s778_s23 = sshll.u32 %s936_s22, 4  ;;  %s779_s23 = int_to_ptr.vmem [resolvable:$false] %s778_s23 }
  0x2f   : > { %s780_s7 = scalar_lea.vmem %s779_s23, 1024  ;;  %p781_p9 = scmp.lt.s32.totalorder %s1057_s10, %s779_s23 }
  0x30   : > { %p776_p3 = pnand %p774_p1, %p1065_p2  ;;  %p782_p8 = scmp.lt.s32.totalorder %s780_s7, %s773_s4 }
  0x32   : > { %p777_p11 = pneg %p776_p3  ;;  %p783_p5 = por %p782_p8, %p781_p9 }
  0x34   : > { %p784_p6 = pnand %p783_p5, %p777_p11 }
  0x36   : > { %787 = shalt.err (!%p784_p6)
}
  0x37   : > { %s1357_s19 = smov 512   ;;  %s1358_s6 = smov 128  }
  0x38   : > { %s1360_s9 = smov 8   ;;  %s233_s4 = scalar_lea.vmem [#allocation7], %s639_s5 }
  0x39   : > { %693 = dma.hbm_to_vmem [thread:$0]  (!%p1043_p0), %s1053_s8, 512, %s1057_s10, %s1059_s11, %s1357_s19, %s1358_s6, %s1360_s9  }
  0x3a   : > { %s245_s22 = sshll.u32 %s233_s4, 4  ;;  %p645_p8 = scmp.ge.s32.totalorder %s934_s17, 1  ;;  %s1095_s22 = int_to_ptr.vmem [resolvable:$true] %s245_s22 }
  0x3b   : > { %p253_p9 = scmp.lt.s32.totalorder %s934_s17, 3  ;;  %s636_s7 = sshll.u32 %s1036_s28, 7 }
  0x3c   : > { %s1107_s16 = scalar_lea.hbm %s1349_s0, %s1039_s29  ;;  %s676_s5 = sadd.s32 384, %s1039_s29 }
  0x3d   : > { %p1098_p11 = pnand %p645_p8, %p253_p9  ;;  %s184_s8 = scalar_lea.vmem [#allocation2], %s636_s7 }
  0x3e   : > { %s193_s10 = sshll.u32 %s184_s8, 4  ;;  %s1113_s6 = scalar_lea.hbm %s1351_s2, %s676_s5  ;;  %s1115_s10 = int_to_ptr.vmem [resolvable:$true] %s193_s10 }
  0x3f   : > { %s1375_s23 = scalar_select %p1098_p11, 1, 0 }
  0x40   : > { %s181_s9 = scalar_lea.sflag [#allocation3], %s1036_s28  ;;  %s788_s26 = scalar_lea.hbm %s1107_s16, 2048 }
  0x41   : > { %p789_p12 = scmp.ne.s32.totalorder %s1107_s16, %s788_s26  ;;  %s793_s14 = scalar_lea.hbm %s1349_s0, 4096 }
  0x42   : > { %p794_p10 = scmp.lt.u32.totalorder %s1107_s16, %s1349_s0  ;;  %p795_p13 = scmp.lt.u32.totalorder %s793_s14, %s788_s26 }
  0x43   : > { %p791_p4 = pnand %p789_p12, %p1065_p2  ;;  %p797_p3 = scmp.lt.u32.totalorder %s788_s26, %s1107_s16 }
  0x44   : > { %p796_p1 = por %p795_p13, %p794_p10 }
  0x45   : > { %p792_p7 = pneg %p791_p4 }
  0x46   : > { %p798_p5 = por %p797_p3, %p796_p1 }
  0x48   : > { %p799_p6 = pnand %p798_p5, %p792_p7 }
  0x4a   : > { %802 = shalt.err (!%p799_p6)
}
  0x4b   : > { %s803_s19 = scalar_lea.vmem %s1115_s10, 2048  ;;  %s940_s5 = smov [#allocation2]  }
  0x4c   : > { %p804_p8 = scmp.ne.s32.totalorder %s1115_s10, %s803_s19  ;;  %s808_s8 = sshll.u32 %s940_s5, 4  ;;  %s809_s8 = int_to_ptr.vmem [resolvable:$false] %s808_s8 }
  0x4d   : > { %s810_s4 = scalar_lea.vmem %s809_s8, 4096  ;;  %p811_p4 = scmp.lt.s32.totalorder %s1115_s10, %s809_s8 }
  0x4e   : > { %p806_p9 = pnand %p804_p8, %p1065_p2  ;;  %p812_p11 = scmp.lt.s32.totalorder %s810_s4, %s803_s19 }
  0x50   : > { %p807_p12 = pneg %p806_p9  ;;  %p813_p10 = por %p812_p11, %p811_p4 }
  0x52   : > { %p814_p13 = pnand %p813_p10, %p807_p12 }
  0x54   : > { %817 = shalt.err (!%p814_p13)
}
  0x55   : > { %s1376_s14 = smov 8   ;;  %s1377_s26 = smov 128  }
  0x56   : > { %690 = dma.hbm_to_vmem [thread:$0]  (!%p1043_p0), %s1107_s16, 2048, %s1115_s10, %s181_s9, %s1377_s26, %s1377_s26, %s1376_s14  }
  0x57   : > { %s818_s1 = scalar_lea.hbm %s1113_s6, 512  ;;  %s823_s7 = scalar_lea.hbm %s1351_s2, 4096 }
  0x58   : > { %p819_p7 = scmp.ne.s32.totalorder %s1113_s6, %s818_s1  ;;  %p824_p3 = scmp.lt.u32.totalorder %s1113_s6, %s1351_s2 }
  0x59   : > { %p825_p5 = scmp.lt.u32.totalorder %s823_s7, %s818_s1  ;;  %p827_p8 = scmp.lt.u32.totalorder %s818_s1, %s1113_s6 }
  0x5a   : > { %p821_p11 = pnand %p819_p7, %p1065_p2 }
  0x5b   : > { %p826_p6 = por %p825_p5, %p824_p3 }
  0x5c   : > { %p822_p1 = pneg %p821_p11 }
  0x5d   : > { %p828_p9 = por %p827_p8, %p826_p6 }
  0x5f   : > { %p829_p12 = pnand %p828_p9, %p822_p1 }
  0x61   : > { %832 = shalt.err (!%p829_p12)
}
  0x62   : > { %s833_s16 = scalar_lea.vmem %s1095_s22, 512  ;;  %s941_s28 = smov [#allocation7]  }
  0x63   : > { %p834_p4 = scmp.ne.s32.totalorder %s1095_s22, %s833_s16  ;;  %s838_s9 = sshll.u32 %s941_s28, 4  ;;  %s839_s9 = int_to_ptr.vmem [resolvable:$false] %s838_s9 }
  0x64   : > { %s840_s10 = scalar_lea.vmem %s839_s9, 1024  ;;  %p841_p7 = scmp.lt.s32.totalorder %s1095_s22, %s839_s9 }
  0x65   : > { %p836_p10 = pnand %p834_p4, %p1065_p2  ;;  %p842_p11 = scmp.lt.s32.totalorder %s840_s10, %s833_s16 }
  0x67   : > { %p837_p13 = pneg %p836_p10  ;;  %p843_p3 = por %p842_p11, %p841_p7 }
  0x69   : > { %p844_p5 = pnand %p843_p3, %p837_p13 }
  0x6b   : > { %847 = shalt.err (!%p844_p5)
}
  0x6c   : > { %s1378_s8 = smov 512   ;;  %p1379_p2 = scmp.ne.s32.totalorder %s1375_s23, 0 }
  0x6d   : > { %696 = dma.hbm_to_vmem [thread:$0]  (!%p1043_p0), %s1113_s6, 512, %s1095_s22, %s1059_s11, %s1378_s8, %s1377_s26, %s1376_s14  }
  0x6e   : > { %257 = sbr.rel (%p1379_p2) target bundleno = 278 (0x116), region = 32  ;;  %s1172_s21 = sand.u32 (!%p1379_p2), 1, %s918_s13  }
  0x6f   : > { %s646_s4 = sshll.u32 (!%p1379_p2), %s1172_s21, 7  ;;  %s260_s1 = scalar_lea.sflag (!%p1379_p2), [#allocation3], %s1172_s21 }
  0x70   : > { %s1176_s20 = scalar_lea.vmem (!%p1379_p2), [#allocation2], %s646_s4  ;;  %p1380_p1 = scmp.ne.s32.totalorder (!%p1379_p2), %s1368_s24, 0 }
  0x75   : > { %901 = dma.done.wait (%p1380_p1), %s260_s1, 2048  }
  0x76   : > { %903 = vsyncadd (%p1380_p1), %s260_s1, 4294965248  ;;  %s268_s30 = sand.u32 1, %s998_s18   ;;  %s1184_s11 = sshll.u32 %s1172_s21, 5 }
  0x77   : > { %s269_s6 = scalar_lea.sflag [#allocation6], %s268_s30  ;;  %s1187_s22 = scalar_lea.vmem [#allocation5], %s1184_s11 }
  0x78   : > { %905 = dma.done.wait (%p1380_p1), %s269_s6, 1024  }
  0x79   : > { %907 = vsyncadd (%p1380_p1), %s269_s6, 4294966272  ;;  %v326_v0 = vld [vmem:[%s1176_s20 + $0x10] sm:$0xff]  ;;  %v324_v4 = vld [vmem:[%s1176_s20] sm:$0xff]  ;;  %s942_s18 = smov 1   ;;  %s943_s24 = smov 127   ;;  %v387_v30 = vlaneseq }
  0x7a   : > { %v652_v1 = vld [vmem:[%s1176_s20 + $0x30] sm:$0xff]  ;;  %v650_v5 = vld [vmem:[%s1176_s20 + $0x20] sm:$0xff]  ;;  %v327_v9 = vld [vmem:[%s1176_s20 + $0x18] sm:$0xff]  ;;  %s281_s23 = scalar_lea.vmem [#allocation7], %s1184_s11  ;;  %s313_s14 = scalar_lea.vmem [#allocation8], %s1184_s11 }
  0x7b   : > { %v658_v2 = vld [vmem:[%s1176_s20 + $0x50] sm:$0xff]  ;;  %v337_v3 = vadd.f32 %v652_v1, %v326_v0  ;;  %v335_v7 = vadd.f32 %v650_v5, %v324_v4  ;;  %v656_v8 = vld [vmem:[%s1176_s20 + $0x40] sm:$0xff]  ;;  %v653_v12 = vld [vmem:[%s1176_s20 + $0x38] sm:$0xff]  ;;  %v1228_v33 = vshrl.u32 %v387_v30, 7  ;;  %v1232_v39 = vand.u32 127, %v387_v30  ;;  %s498_s26 = sshll.u32 %s313_s14, 4  ;;  %s1295_s26 = int_to_ptr.vmem [resolvable:$true] %s498_s26 }
  0x7c   : > { %v664_v6 = vld [vmem:[%s1176_s20 + $0x70] sm:$0xff]  ;;  %v662_v11 = vld [vmem:[%s1176_s20 + $0x60] sm:$0xff]  ;;  %v659_v13 = vld [vmem:[%s1176_s20 + $0x58] sm:$0xff]  ;;  %v338_v15 = vadd.f32 %v653_v12, %v327_v9  ;;  %s677_s29 = sshll.u32 %s926_s15, 9  ;;  %s483_s16 = scalar_lea.sflag [#allocation4], %s1172_s21 }
  0x7d   : > { %v352_v10 = vadd.f32 %v658_v2, %v337_v3  ;;  %v350_v14 = vadd.f32 %v656_v8, %v335_v7  ;;  %v325_v16 = vld [vmem:[%s1176_s20 + $0x8] sm:$0xff]  ;;  %v665_v20 = vld [vmem:[%s1176_s20 + $0x78] sm:$0xff]  ;;  %v328_v28 = vld [vmem:[%s1187_s22] sm:$0xff]  ;;  %v409_v41 = vsub.s32 0, %v1228_v33  ;;  %vm402_vm0 = vcmp.lt.s32.totalorder %v1228_v33, 1  ;;  %s1300_s5 = scalar_lea.hbm %s1352_s3, %s677_s29  ;;  %s848_s15 = scalar_lea.vmem %s1295_s26, 512 }
  0x7e   : > { %v651_v17 = vld [vmem:[%s1176_s20 + $0x28] sm:$0xff]  ;;  %v353_v23 = vadd.f32 %v659_v13, %v338_v15  ;;  %v660_v32 = vld [vmem:[%s1187_s22 + $0x10] sm:$0xff]  ;;  %v329_v35 = vld [vmem:[%s281_s23] sm:$0xff]  ;;  %vm436_vm1 = vcmp.eq.s32.totalorder %v1232_v39, 0  ;;  %vm394_vm2 = vcmp.eq.s32.totalorder %v1228_v33, 0  ;;  %vm423_vm3 = vcmp.lt.s32.totalorder %v1228_v33, 7  ;;  %p849_p0 = scmp.ne.s32.totalorder %s1295_s26, %s848_s15 }
  0x7f   : > { %v657_v18 = vld [vmem:[%s1176_s20 + $0x48] sm:$0xff]  ;;  %v1207_v19 = vadd.f32 %v664_v6, %v352_v10  ;;  %v336_v21 = vadd.f32 %v651_v17, %v325_v16  ;;  %v1210_v22 = vadd.f32 %v662_v11, %v350_v14  ;;  %v666_v37 = vld [vmem:[%s1187_s22 + $0x18] sm:$0xff]  ;;  %v661_v42 = vld [vmem:[%s281_s23 + $0x10] sm:$0xff]  ;;  %v391_v52 = vadd.s32 24, %v1228_v33  ;;  %p1381_p6 = scmp.ne.s32.totalorder %s1369_s25, 0  ;;  %s944_s28 = smov [#allocation8]  }
  0x80   : > { %v663_v24 = vld [vmem:[%s1176_s20 + $0x68] sm:$0xff]  ;;  %v1215_v26 = vadd.f32 %v665_v20, %v353_v23  ;;  %v667_v49 = vld [vmem:[%s281_s23 + $0x18] sm:$0xff]  ;;  %vm449_vm4 = vcmp.eq.s32.totalorder %v1232_v39, 127  ;;  %v430_v61 = vsub.s32 7, %v1228_v33  ;;  %s852_s9 = sshll.u32 %s944_s28, 4  ;;  %s853_s9 = int_to_ptr.vmem [resolvable:$false] %s852_s9 }
  0x81   : > { %441 = vrot.lane.b32.xlu1 %v1207_v19, %s942_s18  ;;  %v351_v25 = vadd.f32 %v657_v18, %v336_v21  ;;  %437 = vrot.lane.b32.xlu0 %v1210_v22, %s942_s18  ;;  %v654_v29 = vld [vmem:[%s1187_s22 + $0x8] sm:$0xff]  ;;  %v398_v44 = vrot.slane %v1210_v22, 7  ;;  %v400_v53 = vrot.slane %v1207_v19, 7  ;;  %v421_v55 = vrot.slane %v1207_v19, 1  ;;  %p850_p8 = pnand %p849_p0, %p1381_p6  ;;  %s854_s10 = scalar_lea.vmem %s853_s9, 1024 }
  0x82   : > { %v341_v31 = vadd.f32 %v654_v29, %v328_v28  ;;  %v655_v36 = vld [vmem:[%s281_s23 + $0x8] sm:$0xff]  ;;  %v401_v43 = vrot.slane %v1215_v26, 7  ;;  %v422_v57 = vrot.slane %v1215_v26, 1  ;;  %v419_v1 = vrot.slane %v1210_v22, 1  ;;  %p855_p12 = scmp.lt.s32.totalorder %s1295_s26, %s853_s9  ;;  %p856_p4 = scmp.lt.s32.totalorder %s854_s10, %s848_s15 }
  0x83   : > { %v1217_v27 = vadd.f32 %v663_v24, %v351_v25  ;;  %v344_v38 = vadd.f32 %v655_v36, %v329_v35  ;;  %vm418_vm5 = vcmp.eq.s32.totalorder %v391_v52, 31  ;;  %p851_p9 = pneg %p850_p8 }
  0x84   : > { %v356_v34 = vadd.f32 %v660_v32, %v341_v31  ;;  %v406_v51 = vsel %vm402_vm0, %v401_v43, %v398_v44  ;;  %v403_v2 = vsel %vm402_vm0, %v400_v53, %v401_v43  ;;  %v427_v7 = vsel %vm423_vm3, %v422_v57, %v419_v1  ;;  %p857_p10 = por %p856_p4, %p855_p12 }
  0x85   : > { %443 = vrot.lane.b32.xlu1 %v1215_v26, %s942_s18  ;;  %439 = vrot.lane.b32.xlu0 %v1217_v27, %s942_s18  ;;  %v359_v47 = vadd.f32 %v661_v42, %v344_v38  ;;  %v399_v50 = vrot.slane %v1217_v27, 7  ;;  %v420_v56 = vrot.slane %v1217_v27, 1 }
  0x86   : > { %v371_v40 = vadd.f32 %v666_v37, %v356_v34  ;;  %p858_p13 = pnand %p857_p10, %p851_p9 }
  0x87   : > { %v405_v59 = vsel %vm402_vm0, %v398_v44, %v399_v50  ;;  %v374_v60 = vadd.f32 %v667_v49, %v359_v47  ;;  %v404_v3 = vsel %vm402_vm0, %v399_v50, %v400_v53  ;;  %v425_v6 = vsel %vm423_vm3, %v420_v56, %v421_v55 }
  0x88   : > { %v410_v48 = vrot.slane %v371_v40, %v409_v41  ;;  %v426_v15 = vsel %vm423_vm3, %v419_v1, %v420_v56 }
  0x89   : > { %452 = vrot.lane.b32.xlu1 %v1217_v27, %s943_s24  ;;  %450 = vrot.lane.b32.xlu0 %v1210_v22, %s943_s24  ;;  %v431_v12 = vrot.slane %v374_v60, %v430_v61 }
  0x8a   : > { %v411_v62 = vsel %vm394_vm2, %v410_v48, %v406_v51 }
  0x8b   : > { %v435_v25 = vsel %vm418_vm5, %v431_v12, %v427_v7 }
  0x8d   : > { %456 = vrot.lane.b32.xlu1 %v1215_v26, %s943_s24  ;;  %454 = vrot.lane.b32.xlu0 %v1207_v19, %s943_s24 }
  0xf3   : > { %v442_v45 = vpop.permute.xlu1 %441  ;;  %v438_v46 = vpop.permute.xlu0 %437 }
  0xf4   : > { %v445_v63 = vsel %vm436_vm1, %v1210_v22, %v438_v46  ;;  %v447_v13 = vsel %vm436_vm1, %v1207_v19, %v442_v45 }
  0xf5   : > { %v462_v8 = vsub.f32 %v411_v62, %v445_v63  ;;  %v464_v23 = vsub.f32 %v404_v3, %v447_v13 }
  0xf7   : > { %v444_v54 = vpop.permute.xlu1 %443  ;;  %v440_v58 = vpop.permute.xlu0 %439 }
  0xf8   : > { %v446_v0 = vsel %vm436_vm1, %v1217_v27, %v440_v58  ;;  %v448_v9 = vsel %vm436_vm1, %v1215_v26, %v444_v54 }
  0xf9   : > { %v463_v4 = vsub.f32 %v405_v59, %v446_v0  ;;  %v465_v18 = vsub.f32 %v403_v2, %v448_v9 }
  0xfb   : > { %v453_v5 = vpop.permute.xlu1 %452  ;;  %v451_v11 = vpop.permute.xlu0 %450 }
  0xfc   : > { %v459_v10 = vsel %vm449_vm4, %v1217_v27, %v453_v5  ;;  %v458_v16 = vsel %vm449_vm4, %v1210_v22, %v451_v11  ;;  %v424_v22 = vsel %vm423_vm3, %v421_v55, %v422_v57 }
  0xfd   : > { %v467_v14 = vadd.f32 %v463_v4, %v459_v10  ;;  %v466_v17 = vadd.f32 %v462_v8, %v458_v16 }
  0xff   : > { %v471_v20 = vsub.f32 %v467_v14, %v425_v6  ;;  %v457_v21 = vpop.permute.xlu1 %456  ;;  %v470_v24 = vsub.f32 %v466_v17, %v426_v15  ;;  %v455_v28 = vpop.permute.xlu0 %454 }
 0x100   : > { %v461_v27 = vsel %vm449_vm4, %v1215_v26, %v457_v21  ;;  %v460_v31 = vsel %vm449_vm4, %v1207_v19, %v455_v28 }
 0x101   : > { %v475_v29 = vmul.f32 0.5, %v471_v20  ;;  %v469_v30 = vadd.f32 %v465_v18, %v461_v27  ;;  %v474_v32 = vmul.f32 0.5, %v470_v24  ;;  %v468_v34 = vadd.f32 %v464_v23, %v460_v31 }
 0x103   : > { %479 = vst [vmem:[%s313_s14 + $0x8] sm:$0xff] %v475_v29  ;;  %v473_v35 = vsub.f32 %v469_v30, %v435_v25  ;;  %478 = vst [vmem:[%s313_s14] sm:$0xff] %v474_v32  ;;  %v472_v26 = vsub.f32 %v468_v34, %v424_v22 }
 0x105   : > { %v477_v33 = vmul.f32 0.5, %v473_v35  ;;  %v476_v19 = vmul.f32 0.5, %v472_v26 }
 0x107   : > { %481 = vst [vmem:[%s313_s14 + $0x18] sm:$0xff] %v477_v33  ;;  %480 = vst [vmem:[%s313_s14 + $0x10] sm:$0xff] %v476_v19 }
 0x108   : > { %861 = shalt.err (!%p858_p13)
}
 0x109   : > { %s862_s8 = scalar_lea.hbm %s1300_s5, 512  ;;  %s866_s20 = scalar_lea.hbm %s1352_s3, 1024 }
 0x10a   : > { %p863_p7 = scmp.ne.s32.totalorder %s1300_s5, %s862_s8  ;;  %p867_p5 = scmp.lt.u32.totalorder %s1300_s5, %s1352_s3 }
 0x10b   : > { %p868_p2 = scmp.lt.u32.totalorder %s866_s20, %s862_s8  ;;  %p870_p0 = scmp.lt.u32.totalorder %s862_s8, %s1300_s5 }
 0x10c   : > { %p864_p11 = pnand %p863_p7, %p1381_p6 }
 0x10d   : > { %p869_p1 = por %p868_p2, %p867_p5 }
 0x10e   : > { %p865_p3 = pneg %p864_p11 }
 0x10f   : > { %p871_p8 = por %p870_p0, %p869_p1 }
 0x111   : > { %p872_p9 = pnand %p871_p8, %p865_p3 }
 0x113   : > { %875 = shalt.err (!%p872_p9)
}
 0x114   : > { %s945_s6 = smov 128   ;;  %s946_s22 = smov 8  }
 0x115   : > { %685 = dma.vmem_to_hbm [thread:$0]  (%p1381_p6), %s1295_s26, 512, %s1300_s5, %s483_s16, %s945_s6, %s945_s6, %s946_s22  }
 0x116 PF: > { %s513_s18 = sand.u32 1, %s914_s12   ;;  %p1382_p12 = scmp.ne.s32.totalorder %s1371_s27, 0 }
 0x117   : > { %p1383_p4 = scmp.ge.s32.totalorder %s934_s17, 2  ;;  %s514_s24 = scalar_lea.sflag [#allocation4], %s513_s18 }
 0x119   : > { %p698_p10 = pnand %p1383_p4, %p1382_p12 }
 0x11b   : > { %909 = dma.done.wait (!%p698_p10), %s514_s24, 512  }
 0x11c   : > { %911 = vsyncadd (!%p698_p10), %s514_s24, 4294966784  ;;  %s22_s17 = sadd.s32 1, %s934_s17   ;;  %s1384_s23 = sld [smem:[#allocation12_spill]] }
 0x11d   : > { %p19_p13 = scmp.ge.s32.totalorder %s22_s17, 4   ;;  %s1385_s14 = sld [smem:[#allocation15_spill]] }
 0x11e   : > { %s1386_s15 = sld [smem:[#allocation13_spill]]  ;;  %s1387_s16 = sld [smem:[#allocation14_spill]] }
 0x11f   : > { %s1388_s12 = smov %s918_s13  ;;  %21 = sbr.rel (!%p19_p13) target bundleno = 10 (0xa), region = 110 }
 0x122   : > { %s1389_s13 = smov %s1384_s23 }
 0x126   :  { %519 = vsyncpa [#allocation3], 1 }
 0x127   :  { %521 = vsyncpa [#allocation3 + $0x1], 1 }
 0x128   :  { %522 = vsyncpa [#allocation6], 1 }
 0x129   :  { %524 = vsyncpa [#allocation6 + $0x1], 1 }
 0x12a   :  { %525 = vsyncpa [#allocation4], 1 }
 0x12b   :  { %527 = vsyncpa [#allocation4 + $0x1], 1 }

</bundles_post_ra>
